<compile_context>
chip_gen: v5e
topology: v5e:2x2
jax: 0.10.0
libtpu: 0.0.40
codegen_flags: <defaults>
</compile_context>

<pallas_src>
import math

import jax
import jax.numpy as jnp
from jax import lax
from jax.experimental import pallas as pl
from jax.experimental.pallas import tpu as pltpu


def _conv_matmul_kernel(w_ref, p_ref, o_ref):
    # w_ref: (Cout, Kp)     flattened + zero-padded conv weight (resident)
    # p_ref: (1, Kp, thw)   im2col patches for one (batch, spatial-tile) block
    # o_ref: (1, Cout, thw) lane-dense output tile
    o_ref[0] = jnp.dot(
        w_ref[...], p_ref[0],
        preferred_element_type=jnp.float32).astype(o_ref.dtype)


def _pick_hw_tile(hw, max_tile=4096):
    """Largest spatial tile <= max_tile that divides HW and is a multiple of
    128 (or the full HW when it is small / indivisible)."""
    if hw <= max_tile:
        return hw
    for t in range(max_tile - (max_tile % 128), 127, -128):
        if hw % t == 0:
            return t
    # TODO(synk): pad HW to a multiple of 128 in the im2col glue instead of
    # falling back to a single huge tile for pathological H*W.
    return hw


def inpaint_head_forward(x_nchw, weight_oihw):
    """x_nchw: (N, 5, H, W) f32, weight_oihw: (320, 5, 3, 3) f32 -> (N, 320, H, W)."""
    N, Cin, H, W = x_nchw.shape
    Cout, _, Kh, Kw = weight_oihw.shape
    K = Cin * Kh * Kw                    # 45
    Kp = ((K + 7) // 8) * 8              # 48, sublane aligned
    HW = H * W
    thw = _pick_hw_tile(HW)
    n_hw = HW // thw

    # --- JAX glue: replicate pad + im2col + weight flatten (pure layout) ---
    x_pad = jnp.pad(x_nchw, ((0, 0), (0, 0), (1, 1), (1, 1)), mode="edge")
    # patches[n, (ci, ky, kx), y*W + x] = x_pad[n, ci, y+ky, x+kx]
    patches = jnp.stack(
        [x_pad[:, :, ky:ky + H, kx:kx + W]
         for ky in range(Kh) for kx in range(Kw)],
        axis=2,                                   # (N, Cin, Kh*Kw, H, W)
    ).reshape(N, K, HW)
    patches = jnp.pad(patches, ((0, 0), (0, Kp - K), (0, 0)))
    # weight (Cout, Cin, Kh, Kw) -> (Cout, Cin*Kh*Kw); same (ci, ky, kx) order
    w_mat = jnp.pad(weight_oihw.reshape(Cout, K), ((0, 0), (0, Kp - K)))

    cost = pl.CostEstimate(
        flops=2 * N * Cout * Kp * HW,
        transcendentals=0,
        bytes_accessed=4 * (N * Kp * HW + Cout * Kp + N * Cout * HW),
    )

    out = pl.pallas_call(
        _conv_matmul_kernel,
        out_shape=jax.ShapeDtypeStruct((N, Cout, HW), x_nchw.dtype),
        grid_spec=pltpu.PrefetchScalarGridSpec(
            num_scalar_prefetch=0,
            grid=(N, n_hw),
            in_specs=[
                pl.BlockSpec((Cout, Kp), lambda b, s: (0, 0)),   # weight, resident
                pl.BlockSpec((1, Kp, thw), lambda b, s: (b, 0, s)),
            ],
            out_specs=pl.BlockSpec((1, Cout, thw), lambda b, s: (b, 0, s)),
        ),
        compiler_params=pltpu.CompilerParams(
            dimension_semantics=("parallel", "parallel")),
        cost_estimate=cost,
    )(w_mat, patches)

    return out.reshape(N, Cout, H, W)


def _init_head_weight(key):
    # nn.init.kaiming_uniform_(w, a=sqrt(5)) on shape (320, 5, 3, 3):
    #   fan_in = 5*3*3 = 45, gain = sqrt(2/(1+a^2)) = sqrt(1/3)
    #   bound = gain * sqrt(3/fan_in) = 1/sqrt(fan_in)
    fan_in = 5 * 3 * 3
    bound = 1.0 / math.sqrt(fan_in)
    return jax.random.uniform(key, (320, 5, 3, 3), jnp.float32,
                              minval=-bound, maxval=bound)


def _reference(x_nchw, weight_oihw):
    x_pad = jnp.pad(x_nchw, ((0, 0), (0, 0), (1, 1), (1, 1)), mode="edge")
    return lax.conv_general_dilated(
        x_pad, weight_oihw, window_strides=(1, 1), padding="VALID",
        dimension_numbers=("NCHW", "OIHW", "NCHW"))


if __name__ == "__main__":
    key = jax.random.PRNGKey(0)
    k_w, k_x = jax.random.split(key)

    weight = _init_head_weight(k_w)                           # (320, 5, 3, 3)
    x = jax.random.normal(k_x, (2, 5, 16, 16), jnp.float32)   # NCHW, Cin = 5

    out = inpaint_head_forward(x, weight)
    out = jax.block_until_ready(out)

    ref = _reference(x, weight)
    assert out.shape == (2, 320, 16, 16)
    assert jnp.allclose(out, ref, atol=1e-4, rtol=1e-4)

    print("KERNEL_OK")
</pallas_src>

<mosaic_0001>
module attributes {stable_mosaic.version = 11 : i64} {
  func.func @_conv_matmul_kernel(%arg0: i32, %arg1: i32, %arg2: memref<320x48xf32, #tpu.memory_space<vmem>>, %arg3: memref<1x48x256xf32, #tpu.memory_space<vmem>>, %arg4: memref<1x320x256xf32, #tpu.memory_space<vmem>>) attributes {dimension_semantics = [#tpu.dimension_semantics<parallel>, #tpu.dimension_semantics<parallel>], iteration_bounds = array<i64: 2, 1>, scalar_prefetch = 0 : i64, scratch_operands = 0 : i64, tpu.core_type = #tpu.core_type<tc>, window_params = [{pipeline_mode = #tpu.pipeline_mode<synchronous>, transform_indices = @transform_0, window_bounds = array<i64: 320, 48>}, {transform_indices = @transform_1, window_bounds = array<i64: 1, 48, 256>}, {transform_indices = @transform_2, window_bounds = array<i64: 1, 320, 256>}]} {
    %c0 = arith.constant 0 : index
    %c0_0 = arith.constant 0 : index
    %0 = vector.load %arg2[%c0, %c0_0] : memref<320x48xf32, #tpu.memory_space<vmem>>, vector<320x48xf32>
    %c0_1 = arith.constant 0 : index
    %c0_2 = arith.constant 0 : index
    %c0_3 = arith.constant 0 : index
    %1 = vector.load %arg3[%c0_1, %c0_2, %c0_3] : memref<1x48x256xf32, #tpu.memory_space<vmem>>, vector<1x48x256xf32>
    %2 = vector.shape_cast %1 : vector<1x48x256xf32> to vector<48x256xf32>
    %cst = arith.constant dense<0.000000e+00> : vector<320x256xf32>
    %3 = tpu.matmul %0, %2, %cst {dimension_numbers = #tpu.dot_dimension_numbers<[1], [0], [0], [1], [0, 0, 1, 1], [], []>} : vector<320x48xf32>, vector<48x256xf32>, vector<320x256xf32> -> vector<320x256xf32>
    %c0_4 = arith.constant 0 : index
    %c0_5 = arith.constant 0 : index
    %c0_6 = arith.constant 0 : index
    %4 = vector.load %arg4[%c0_4, %c0_5, %c0_6] : memref<1x320x256xf32, #tpu.memory_space<vmem>>, vector<1x320x256xf32>
    %5 = vector.shape_cast %4 : vector<1x320x256xf32> to vector<320x256xf32>
    %6 = vector.shape_cast %3 : vector<320x256xf32> to vector<1x320x256xf32>
    tpu.vector_store %arg4[%c0_4, %c0_5, %c0_6], %6 {strides = array<i32>} : memref<1x320x256xf32, #tpu.memory_space<vmem>>, vector<1x320x256xf32>,
    return
  }
  func.func @transform_0(%arg0: i32, %arg1: i32) -> (i32, i32) {
    %c0_i32 = arith.constant 0 : i32
    %c0_i32_0 = arith.constant 0 : i32
    %c0_i32_1 = arith.constant 0 : i32
    return %c0_i32, %c0_i32_0 : i32, i32
  }
  func.func @transform_1(%arg0: i32, %arg1: i32) -> (i32, i32, i32) {
    %c0_i32 = arith.constant 0 : i32
    %c0_i32_0 = arith.constant 0 : i32
    return %arg0, %c0_i32, %arg1 : i32, i32, i32
  }
  func.func @transform_2(%arg0: i32, %arg1: i32) -> (i32, i32, i32) {
    %c0_i32 = arith.constant 0 : i32
    %c0_i32_0 = arith.constant 0 : i32
    return %arg0, %c0_i32, %arg1 : i32, i32, i32
  }
}

</mosaic_0001>

<bundles_post_ra>
// kernel: tpu_custom_call.1
= control target key start
LH: loop header
LB: loop body
LE: loop exit
PB: predicated region body
PF: predicated region fallthrough
CT: control target
= control target key end

     0   :  { %7 = vsyncpa [#allocation3], 0  ;;  %s1439_s0 = inlined_call_operand.vmem [shape: f32[320,48], index: 0, kind: input, shape index: {}]   ;;  %s1440_s1 = inlined_call_operand.vmem [shape: f32[2,48,256], index: 1, kind: input, shape index: {}]   ;;  %s1441_s2 = inlined_call_operand.hbm [shape: f32[2,320,256], index: 2, kind: output, shape index: {}]  }
   0x1   :  { %9 = vsyncpa [#allocation3 + $0x1], 0  ;;  %s1055_s9 = smov 0   ;;  %s1057_s10 = smov 0  }
   0x2   :  { %s1059_s11 = smov 0   ;;  %s1061_s12 = smov 0  }
   0x3   :  { %s1063_s13 = smov 0   ;;  %s1065_s14 = smov 0  }
   0x4 LB: > { %s797_s15 = sadd.s32 4294967295, %s1036_s14   ;;  %s798_s16 = sadd.s32 4294967294, %s1036_s14   ;;  %s1036_s14 = sphi %s1065_s14, %s15_s14   ;;  %s1032_s13 = sphi %s1063_s13, %s1448_s13   ;;  %s1028_s12 = sphi %s1061_s12, %s1447_s12   ;;  %s1024_s11 = sphi %s1059_s11, %s1446_s11   ;;  %s1020_s10 = sphi %s1057_s10, %s1445_s10   ;;  %s1016_s9 = sphi %s1055_s9, %s1444_s9  }
   0x5   : > { %s27_s17 = sadd.s32 1, %s1032_s13  ;;  %s85_s18 = sadd.s32 1, %s1024_s11 }
   0x6   : > { %p29_p0 = scmp.ge.s32.totalorder %s27_s17, 2  ;;  %p95_p1 = scmp.ne.s32.totalorder %s1024_s11, %s1020_s10 }
   0x7   : > { %p96_p2 = scmp.eq.s32.totalorder %s797_s15, 1  ;;  %p101_p3 = scmp.ne.s32.totalorder %s1020_s10, %s1016_s9 }
   0x8   : > { %s1450_s17 = smov (%p29_p0, %s27_s17), 0  ;;  %p102_p5 = scmp.eq.s32.totalorder %s798_s16, 1 }
   0x9   : > { %p1095_p4 = por %p96_p2, %p95_p1  ;;  %s80_s20 = ssub.s32 %s1032_s13, %s1450_s17 }
   0xa   : > { %p801_p6 = scmp.ge.s32.totalorder %s1036_s14, 1  ;;  %p83_p7 = scmp.eq.s32.totalorder %s80_s20, 0 }
   0xb   : > { %p1102_p8 = por %p102_p5, %p101_p3  ;;  %p136_p9 = scmp.lt.s32.totalorder %s1036_s14, 3 }
   0xc   : > { %s1108_s22 = scalar_select %p83_p7, %s1024_s11, %s85_s18  }
   0xd   : > { %p137_p10 = pnand %p801_p6, %p136_p9 }
   0xe   : > { %p163_p11 = scmp.lt.s32.totalorder (!%p137_p10), %s1028_s12, 1  ;;  %s159_s8 = sand.u32 (!%p137_p10), 1, %s1020_s10  }
   0xf   : > { %140 = sbr.rel (%p137_p10) target bundleno = 326 (0x146), region = 28  ;;  %s978_s5 = scalar_lea.hbm (!%p137_p10), %s1441_s2, 1280 }
  0x10   : > { %s898_s18 = smul.u32 (!%p137_p10), 640, %s159_s8 }
  0x11   : > { %s900_s20 = smul.u32 (!%p137_p10), 640, %s1028_s12 }
  0x12   : > { %s1286_s26 = scalar_lea.vmem (!%p137_p10), [#allocation2], %s898_s18 }
  0x13   : > { %s714_s25 = scalar_lea.hbm (!%p137_p10), %s1441_s2, %s900_s20 }
  0x14   : > { %s164_s23 = scalar_select %p163_p11, %s1028_s12, 1  ;;  %v193_v12 = vld [vmem:[%s1439_s0 + $0xa0] sm:$0xff]  ;;  %vm225_vm0 = vcmask 392192   ;;  %v194_v14 = vld [vmem:[%s1439_s0 + $0xa8] sm:$0xff]  ;;  %v195_v16 = vld [vmem:[%s1439_s0 + $0xb0] sm:$0xff] }
  0x15   : > { %v173_v13 = vld [vmem:[%s1439_s0] sm:$0xff]  ;;  %v174_v15 = vld [vmem:[%s1439_s0 + $0x8] sm:$0xff]  ;;  %v175_v17 = vld [vmem:[%s1439_s0 + $0x10] sm:$0xff]  ;;  %s717_s28 = sshll.u32 %s714_s25, 4  ;;  %s701_s12 = scalar_lea.sflag [#allocation3], %s159_s8  ;;  %s718_s28 = int_to_ptr.hbm [resolvable:$true] %s717_s28 }
  0x16   : > { %s899_s24 = smul.u32 96, %s164_s23  ;;  %v196_v18 = vld [vmem:[%s1439_s0 + $0xb8] sm:$0xff]  ;;  %v197_v20 = vld [vmem:[%s1439_s0 + $0xc0] sm:$0xff]  ;;  %v198_v22 = vld [vmem:[%s1439_s0 + $0xc8] sm:$0xff]  ;;  %s972_s29 = sshra.s32 %s718_s28, 4  ;;  %s973_s29 = int_to_ptr.hbm [resolvable:$true] %s972_s29 }
  0x17   : > { %v176_v19 = vld [vmem:[%s1439_s0 + $0x18] sm:$0xff]  ;;  %v177_v21 = vld [vmem:[%s1439_s0 + $0x20] sm:$0xff]  ;;  %v178_v23 = vld [vmem:[%s1439_s0 + $0x28] sm:$0xff]  ;;  %s974_s30 = scalar_lea.hbm %s973_s29, 640  ;;  %p979_p1 = scmp.lt.s32.totalorder %s973_s29, %s1441_s2 }
  0x18   : > { %s170_s27 = scalar_lea.vmem %s1440_s1, %s899_s24  ;;  %v199_v24 = vld [vmem:[%s1439_s0 + $0xd0] sm:$0xff]  ;;  %v200_v26 = vld [vmem:[%s1439_s0 + $0xd8] sm:$0xff]  ;;  %v201_v28 = vld [vmem:[%s1439_s0 + $0xe0] sm:$0xff]  ;;  %p975_p12 = scmp.ne.s32.totalorder %s973_s29, %s974_s30 }
  0x19   : > { %v223_v0 = vld [vmem:[%s170_s27 + $0x50] sm:$0xff]  ;;  %v224_v1 = vld [vmem:[%s170_s27 + $0x58] sm:$0xff]  ;;  %v221_v2 = vld [vmem:[%s170_s27 + $0x40] sm:$0xff]  ;;  %p980_p2 = scmp.lt.s32.totalorder %s978_s5, %s974_s30 }
  0x1a   : > { %886 = vmatpush.msra.mxu2 %v223_v0  ;;  %892 = vmatpush.msra.mxu3 %v224_v1  ;;  %v222_v3 = vld [vmem:[%s170_s27 + $0x48] sm:$0xff]  ;;  %v219_v4 = vld [vmem:[%s170_s27 + $0x30] sm:$0xff]  ;;  %v220_v5 = vld [vmem:[%s170_s27 + $0x38] sm:$0xff]  ;;  %p976_p13 = pnand %p975_p12, %p1095_p4 }
  0x1b   : > { %356 = vmatpush.msra.mxu0 %v223_v0  ;;  %493 = vmatpush.msra.mxu1 %v224_v1  ;;  %v217_v6 = vld [vmem:[%s170_s27 + $0x20] sm:$0xff]  ;;  %v218_v7 = vld [vmem:[%s170_s27 + $0x28] sm:$0xff]  ;;  %v215_v8 = vld [vmem:[%s170_s27 + $0x10] sm:$0xff]  ;;  %p981_p3 = por %p980_p2, %p979_p1 }
  0x1c   : > { %887 = vmatpush.msra.mxu2 %v221_v2  ;;  %893 = vmatpush.msra.mxu3 %v222_v3  ;;  %v216_v9 = vld [vmem:[%s170_s27 + $0x18] sm:$0xff]  ;;  %v213_v10 = vld [vmem:[%s170_s27] sm:$0xff]  ;;  %v214_v11 = vld [vmem:[%s170_s27 + $0x8] sm:$0xff]  ;;  %s715_s27 = sshll.u32 %s1286_s26, 4  ;;  %p977_p0 = pneg %p976_p13  ;;  %s716_s27 = int_to_ptr.vmem [resolvable:$true] %s715_s27 }
  0x1d   : > { %357 = vmatpush.msra.mxu0 %v221_v2  ;;  %494 = vmatpush.msra.mxu1 %v222_v3  ;;  %v179_v25 = vld [vmem:[%s1439_s0 + $0x30] sm:$0xff]  ;;  %v180_v27 = vld [vmem:[%s1439_s0 + $0x38] sm:$0xff]  ;;  %v181_v29 = vld [vmem:[%s1439_s0 + $0x40] sm:$0xff] }
  0x1e   : > { %888 = vmatpush.msra.mxu2 %v219_v4  ;;  %894 = vmatpush.msra.mxu3 %v220_v5  ;;  %v202_v30 = vld [vmem:[%s1439_s0 + $0xe8] sm:$0xff]  ;;  %v203_v32 = vld [vmem:[%s1439_s0 + $0xf0] sm:$0xff]  ;;  %v204_v34 = vld [vmem:[%s1439_s0 + $0xf8] sm:$0xff]  ;;  %p982_p5 = pnand %p981_p3, %p977_p0 }
  0x1f   : > { %358 = vmatpush.msra.mxu0 %v219_v4  ;;  %495 = vmatpush.msra.mxu1 %v220_v5  ;;  %v182_v31 = vld [vmem:[%s1439_s0 + $0x48] sm:$0xff]  ;;  %v183_v33 = vld [vmem:[%s1439_s0 + $0x50] sm:$0xff]  ;;  %v184_v35 = vld [vmem:[%s1439_s0 + $0x58] sm:$0xff] }
  0x20   : > { %889 = vmatpush.msra.mxu2 %v217_v6  ;;  %895 = vmatpush.msra.mxu3 %v218_v7  ;;  %v205_v36 = vld [vmem:[%s1439_s0 + $0x100] sm:$0xff]  ;;  %v206_v38 = vld [vmem:[%s1439_s0 + $0x108] sm:$0xff]  ;;  %v207_v40 = vld [vmem:[%s1439_s0 + $0x110] sm:$0xff] }
  0x21   : > { %359 = vmatpush.msra.mxu0 %v217_v6  ;;  %496 = vmatpush.msra.mxu1 %v218_v7  ;;  %v185_v37 = vld [vmem:[%s1439_s0 + $0x60] sm:$0xff]  ;;  %v186_v39 = vld [vmem:[%s1439_s0 + $0x68] sm:$0xff]  ;;  %v187_v41 = vld [vmem:[%s1439_s0 + $0x70] sm:$0xff] }
  0x22   : > { %890 = vmatpush.msra.mxu2 %v215_v8  ;;  %896 = vmatpush.msra.mxu3 %v216_v9  ;;  %v208_v42 = vld [vmem:[%s1439_s0 + $0x118] sm:$0xff]  ;;  %v209_v44 = vld [vmem:[%s1439_s0 + $0x120] sm:$0xff]  ;;  %v210_v50 = vld [vmem:[%s1439_s0 + $0x128] sm:$0xff] }
  0x23   : > { %360 = vmatpush.msra.mxu0 %v215_v8  ;;  %497 = vmatpush.msra.mxu1 %v216_v9  ;;  %v188_v43 = vld [vmem:[%s1439_s0 + $0x78] sm:$0xff]  ;;  %v189_v47 = vld [vmem:[%s1439_s0 + $0x80] sm:$0xff]  ;;  %v190_v53 = vld [vmem:[%s1439_s0 + $0x88] sm:$0xff] }
  0x24   : > { %891 = vmatpush.msra.mxu2 %v213_v10  ;;  %897 = vmatpush.msra.mxu3 %v214_v11  ;;  %v211_v56 = vld [vmem:[%s1439_s0 + $0x130] sm:$0xff]  ;;  %v212_v62 = vld [vmem:[%s1439_s0 + $0x138] sm:$0xff] }
  0x25   : > { %823 = vmatmul.msk.f32.vlgmr.msra.gmra.mxu2 %vm225_vm0, %v193_v12  ;;  %863 = vmatmul.msk.f32.vlgmr.msra.gmra.mxu3 %vm225_vm0, %v193_v12  ;;  %v191_v59 = vld [vmem:[%s1439_s0 + $0x90] sm:$0xff]  ;;  %v192_v1 = vld [vmem:[%s1439_s0 + $0x98] sm:$0xff] }
  0x26   : > { %361 = vmatpush.msra.mxu0 %v213_v10  ;;  %498 = vmatpush.msra.mxu1 %v214_v11 }
  0x27   : > { %803 = vmatmul.msk.f32.vlgmr.msra.gmra.mxu0 %vm225_vm0, %v173_v13  ;;  %843 = vmatmul.msk.f32.vlgmr.msra.gmra.mxu1 %vm225_vm0, %v173_v13 }
  0x2d   : > { %824 = vmatmul.msk.f32.gmra.mxu2 %vm225_vm0, %v194_v14  ;;  %864 = vmatmul.msk.f32.gmra.mxu3 %vm225_vm0, %v194_v14 }
  0x2f   : > { %804 = vmatmul.msk.f32.gmra.mxu0 %vm225_vm0, %v174_v15  ;;  %844 = vmatmul.msk.f32.gmra.mxu1 %vm225_vm0, %v174_v15 }
  0x35   : > { %825 = vmatmul.msk.f32.gmra.mxu2 %vm225_vm0, %v195_v16  ;;  %865 = vmatmul.msk.f32.gmra.mxu3 %vm225_vm0, %v195_v16 }
  0x37   : > { %805 = vmatmul.msk.f32.gmra.mxu0 %vm225_vm0, %v175_v17  ;;  %845 = vmatmul.msk.f32.gmra.mxu1 %vm225_vm0, %v175_v17 }
  0x3d   : > { %826 = vmatmul.msk.f32.gmra.mxu2 %vm225_vm0, %v196_v18  ;;  %866 = vmatmul.msk.f32.gmra.mxu3 %vm225_vm0, %v196_v18 }
  0x3f   : > { %806 = vmatmul.msk.f32.gmra.mxu0 %vm225_vm0, %v176_v19  ;;  %846 = vmatmul.msk.f32.gmra.mxu1 %vm225_vm0, %v176_v19 }
  0x45   : > { %827 = vmatmul.msk.f32.gmra.mxu2 %vm225_vm0, %v197_v20  ;;  %867 = vmatmul.msk.f32.gmra.mxu3 %vm225_vm0, %v197_v20 }
  0x47   : > { %807 = vmatmul.msk.f32.gmra.mxu0 %vm225_vm0, %v177_v21  ;;  %847 = vmatmul.msk.f32.gmra.mxu1 %vm225_vm0, %v177_v21 }
  0x4d   : > { %828 = vmatmul.msk.f32.gmra.mxu2 %vm225_vm0, %v198_v22  ;;  %868 = vmatmul.msk.f32.gmra.mxu3 %vm225_vm0, %v198_v22 }
  0x4f   : > { %808 = vmatmul.msk.f32.gmra.mxu0 %vm225_vm0, %v178_v23  ;;  %848 = vmatmul.msk.f32.gmra.mxu1 %vm225_vm0, %v178_v23 }
  0x55   : > { %829 = vmatmul.msk.f32.gmra.mxu2 %vm225_vm0, %v199_v24  ;;  %869 = vmatmul.msk.f32.gmra.mxu3 %vm225_vm0, %v199_v24 }
  0x57   : > { %809 = vmatmul.msk.f32.gmra.mxu0 %vm225_vm0, %v179_v25  ;;  %849 = vmatmul.msk.f32.gmra.mxu1 %vm225_vm0, %v179_v25 }
  0x5d   : > { %830 = vmatmul.msk.f32.gmra.mxu2 %vm225_vm0, %v200_v26  ;;  %870 = vmatmul.msk.f32.gmra.mxu3 %vm225_vm0, %v200_v26 }
  0x5f   : > { %810 = vmatmul.msk.f32.gmra.mxu0 %vm225_vm0, %v180_v27  ;;  %850 = vmatmul.msk.f32.gmra.mxu1 %vm225_vm0, %v180_v27 }
  0x65   : > { %831 = vmatmul.msk.f32.gmra.mxu2 %vm225_vm0, %v201_v28  ;;  %871 = vmatmul.msk.f32.gmra.mxu3 %vm225_vm0, %v201_v28 }
  0x67   : > { %811 = vmatmul.msk.f32.gmra.mxu0 %vm225_vm0, %v181_v29  ;;  %851 = vmatmul.msk.f32.gmra.mxu1 %vm225_vm0, %v181_v29 }
  0x6d   : > { %832 = vmatmul.msk.f32.gmra.mxu2 %vm225_vm0, %v202_v30  ;;  %872 = vmatmul.msk.f32.gmra.mxu3 %vm225_vm0, %v202_v30 }
  0x6f   : > { %812 = vmatmul.msk.f32.gmra.mxu0 %vm225_vm0, %v182_v31  ;;  %852 = vmatmul.msk.f32.gmra.mxu1 %vm225_vm0, %v182_v31 }
  0x75   : > { %833 = vmatmul.msk.f32.gmra.mxu2 %vm225_vm0, %v203_v32  ;;  %873 = vmatmul.msk.f32.gmra.mxu3 %vm225_vm0, %v203_v32 }
  0x77   : > { %813 = vmatmul.msk.f32.gmra.mxu0 %vm225_vm0, %v183_v33  ;;  %853 = vmatmul.msk.f32.gmra.mxu1 %vm225_vm0, %v183_v33 }
  0x7d   : > { %834 = vmatmul.msk.f32.gmra.mxu2 %vm225_vm0, %v204_v34  ;;  %874 = vmatmul.msk.f32.gmra.mxu3 %vm225_vm0, %v204_v34 }
  0x7f   : > { %814 = vmatmul.msk.f32.gmra.mxu0 %vm225_vm0, %v184_v35  ;;  %854 = vmatmul.msk.f32.gmra.mxu1 %vm225_vm0, %v184_v35 }
  0x85   : > { %835 = vmatmul.msk.f32.gmra.mxu2 %vm225_vm0, %v205_v36  ;;  %875 = vmatmul.msk.f32.gmra.mxu3 %vm225_vm0, %v205_v36 }
  0x87   : > { %815 = vmatmul.msk.f32.gmra.mxu0 %vm225_vm0, %v185_v37  ;;  %855 = vmatmul.msk.f32.gmra.mxu1 %vm225_vm0, %v185_v37 }
  0x8d   : > { %836 = vmatmul.msk.f32.gmra.mxu2 %vm225_vm0, %v206_v38  ;;  %876 = vmatmul.msk.f32.gmra.mxu3 %vm225_vm0, %v206_v38 }
  0x8f   : > { %816 = vmatmul.msk.f32.gmra.mxu0 %vm225_vm0, %v186_v39  ;;  %856 = vmatmul.msk.f32.gmra.mxu1 %vm225_vm0, %v186_v39 }
  0x95   : > { %837 = vmatmul.msk.f32.gmra.mxu2 %vm225_vm0, %v207_v40  ;;  %877 = vmatmul.msk.f32.gmra.mxu3 %vm225_vm0, %v207_v40 }
  0x97   : > { %817 = vmatmul.msk.f32.gmra.mxu0 %vm225_vm0, %v187_v41  ;;  %857 = vmatmul.msk.f32.gmra.mxu1 %vm225_vm0, %v187_v41 }
  0x9d   : > { %838 = vmatmul.msk.f32.gmra.mxu2 %vm225_vm0, %v208_v42  ;;  %878 = vmatmul.msk.f32.gmra.mxu3 %vm225_vm0, %v208_v42 }
  0x9f   : > { %818 = vmatmul.msk.f32.gmra.mxu0 %vm225_vm0, %v188_v43  ;;  %858 = vmatmul.msk.f32.gmra.mxu1 %vm225_vm0, %v188_v43 }
  0xa4   : > { %v363_v45 = vpop.f32.mrf.mxu0  ;;  %v500_v46 = vpop.f32.mrf.mxu1 }
  0xa5   : > { %839 = vmatmul.msk.f32.gmra.mxu2 %vm225_vm0, %v209_v44  ;;  %879 = vmatmul.msk.f32.gmra.mxu3 %vm225_vm0, %v209_v44  ;;  %620 = vst [vmem:[%s1286_s26] sm:$0xff] %v363_v45 }
  0xa6   : > { %621 = vst [vmem:[%s1286_s26 + $0x8] sm:$0xff] %v500_v46 }
  0xa7   : > { %819 = vmatmul.msk.f32.gmra.mxu0 %vm225_vm0, %v189_v47  ;;  %859 = vmatmul.msk.f32.gmra.mxu1 %vm225_vm0, %v189_v47 }
  0xa8   : > { %v423_v48 = vpop.f32.mrf.mxu2  ;;  %v560_v49 = vpop.f32.mrf.mxu3 }
  0xa9   : > { %660 = vst [vmem:[%s1286_s26 + $0x140] sm:$0xff] %v423_v48 }
  0xaa   : > { %661 = vst [vmem:[%s1286_s26 + $0x148] sm:$0xff] %v560_v49 }
  0xac   : > { %v366_v51 = vpop.f32.mrf.mxu0  ;;  %v503_v52 = vpop.f32.mrf.mxu1 }
  0xad   : > { %840 = vmatmul.msk.f32.gmra.mxu2 %vm225_vm0, %v210_v50  ;;  %880 = vmatmul.msk.f32.gmra.mxu3 %vm225_vm0, %v210_v50  ;;  %622 = vst [vmem:[%s1286_s26 + $0x10] sm:$0xff] %v366_v51 }
  0xae   : > { %623 = vst [vmem:[%s1286_s26 + $0x18] sm:$0xff] %v503_v52 }
  0xaf   : > { %820 = vmatmul.msk.f32.gmra.mxu0 %vm225_vm0, %v190_v53  ;;  %860 = vmatmul.msk.f32.gmra.mxu1 %vm225_vm0, %v190_v53 }
  0xb0   : > { %v426_v54 = vpop.f32.mrf.mxu2  ;;  %v563_v55 = vpop.f32.mrf.mxu3 }
  0xb1   : > { %662 = vst [vmem:[%s1286_s26 + $0x150] sm:$0xff] %v426_v54 }
  0xb2   : > { %663 = vst [vmem:[%s1286_s26 + $0x158] sm:$0xff] %v563_v55 }
  0xb4   : > { %v369_v57 = vpop.f32.mrf.mxu0  ;;  %v506_v58 = vpop.f32.mrf.mxu1 }
  0xb5   : > { %841 = vmatmul.msk.f32.gmra.mxu2 %vm225_vm0, %v211_v56  ;;  %881 = vmatmul.msk.f32.gmra.mxu3 %vm225_vm0, %v211_v56  ;;  %624 = vst [vmem:[%s1286_s26 + $0x20] sm:$0xff] %v369_v57 }
  0xb6   : > { %625 = vst [vmem:[%s1286_s26 + $0x28] sm:$0xff] %v506_v58 }
  0xb7   : > { %821 = vmatmul.msk.f32.gmra.mxu0 %vm225_vm0, %v191_v59  ;;  %861 = vmatmul.msk.f32.gmra.mxu1 %vm225_vm0, %v191_v59 }
  0xb8   : > { %v429_v60 = vpop.f32.mrf.mxu2  ;;  %v566_v61 = vpop.f32.mrf.mxu3 }
  0xb9   : > { %664 = vst [vmem:[%s1286_s26 + $0x160] sm:$0xff] %v429_v60 }
  0xba   : > { %665 = vst [vmem:[%s1286_s26 + $0x168] sm:$0xff] %v566_v61 }
  0xbc   : > { %v372_v63 = vpop.f32.mrf.mxu0  ;;  %v509_v0 = vpop.f32.mrf.mxu1 }
  0xbd   : > { %842 = vmatmul.msk.f32.gmra.mxu2 %vm225_vm0, %v212_v62  ;;  %882 = vmatmul.msk.f32.gmra.mxu3 %vm225_vm0, %v212_v62  ;;  %626 = vst [vmem:[%s1286_s26 + $0x30] sm:$0xff] %v372_v63 }
  0xbe   : > { %627 = vst [vmem:[%s1286_s26 + $0x38] sm:$0xff] %v509_v0 }
  0xbf   : > { %822 = vmatmul.msk.f32.gmra.mxu0 %vm225_vm0, %v192_v1  ;;  %862 = vmatmul.msk.f32.gmra.mxu1 %vm225_vm0, %v192_v1 }
  0xc0   : > { %v432_v2 = vpop.f32.mrf.mxu2  ;;  %v569_v3 = vpop.f32.mrf.mxu3 }
  0xc1   : > { %666 = vst [vmem:[%s1286_s26 + $0x170] sm:$0xff] %v432_v2 }
  0xc2   : > { %667 = vst [vmem:[%s1286_s26 + $0x178] sm:$0xff] %v569_v3 }
  0xc4   : > { %v375_v4 = vpop.f32.mrf.mxu0  ;;  %v512_v5 = vpop.f32.mrf.mxu1 }
  0xc5   : > { %628 = vst [vmem:[%s1286_s26 + $0x40] sm:$0xff] %v375_v4 }
  0xc6   : > { %629 = vst [vmem:[%s1286_s26 + $0x48] sm:$0xff] %v512_v5 }
  0xc8   : > { %v435_v6 = vpop.f32.mrf.mxu2  ;;  %v572_v7 = vpop.f32.mrf.mxu3 }
  0xc9   : > { %668 = vst [vmem:[%s1286_s26 + $0x180] sm:$0xff] %v435_v6 }
  0xca   : > { %669 = vst [vmem:[%s1286_s26 + $0x188] sm:$0xff] %v572_v7 }
  0xcc   : > { %v378_v8 = vpop.f32.mrf.mxu0  ;;  %v515_v9 = vpop.f32.mrf.mxu1 }
  0xcd   : > { %630 = vst [vmem:[%s1286_s26 + $0x50] sm:$0xff] %v378_v8 }
  0xce   : > { %631 = vst [vmem:[%s1286_s26 + $0x58] sm:$0xff] %v515_v9 }
  0xd0   : > { %v438_v10 = vpop.f32.mrf.mxu2  ;;  %v575_v11 = vpop.f32.mrf.mxu3 }
  0xd1   : > { %670 = vst [vmem:[%s1286_s26 + $0x190] sm:$0xff] %v438_v10 }
  0xd2   : > { %671 = vst [vmem:[%s1286_s26 + $0x198] sm:$0xff] %v575_v11 }
  0xd4   : > { %v381_v12 = vpop.f32.mrf.mxu0  ;;  %v518_v13 = vpop.f32.mrf.mxu1 }
  0xd5   : > { %632 = vst [vmem:[%s1286_s26 + $0x60] sm:$0xff] %v381_v12 }
  0xd6   : > { %633 = vst [vmem:[%s1286_s26 + $0x68] sm:$0xff] %v518_v13 }
  0xd8   : > { %v441_v14 = vpop.f32.mrf.mxu2  ;;  %v578_v15 = vpop.f32.mrf.mxu3 }
  0xd9   : > { %672 = vst [vmem:[%s1286_s26 + $0x1a0] sm:$0xff] %v441_v14 }
  0xda   : > { %673 = vst [vmem:[%s1286_s26 + $0x1a8] sm:$0xff] %v578_v15 }
  0xdc   : > { %v384_v16 = vpop.f32.mrf.mxu0  ;;  %v521_v17 = vpop.f32.mrf.mxu1 }
  0xdd   : > { %634 = vst [vmem:[%s1286_s26 + $0x70] sm:$0xff] %v384_v16 }
  0xde   : > { %635 = vst [vmem:[%s1286_s26 + $0x78] sm:$0xff] %v521_v17 }
  0xe0   : > { %v444_v18 = vpop.f32.mrf.mxu2  ;;  %v581_v19 = vpop.f32.mrf.mxu3 }
  0xe1   : > { %674 = vst [vmem:[%s1286_s26 + $0x1b0] sm:$0xff] %v444_v18 }
  0xe2   : > { %675 = vst [vmem:[%s1286_s26 + $0x1b8] sm:$0xff] %v581_v19 }
  0xe4   : > { %v387_v20 = vpop.f32.mrf.mxu0  ;;  %v524_v21 = vpop.f32.mrf.mxu1 }
  0xe5   : > { %636 = vst [vmem:[%s1286_s26 + $0x80] sm:$0xff] %v387_v20 }
  0xe6   : > { %637 = vst [vmem:[%s1286_s26 + $0x88] sm:$0xff] %v524_v21 }
  0xe8   : > { %v447_v22 = vpop.f32.mrf.mxu2  ;;  %v584_v23 = vpop.f32.mrf.mxu3 }
  0xe9   : > { %676 = vst [vmem:[%s1286_s26 + $0x1c0] sm:$0xff] %v447_v22 }
  0xea   : > { %677 = vst [vmem:[%s1286_s26 + $0x1c8] sm:$0xff] %v584_v23 }
  0xec   : > { %v390_v24 = vpop.f32.mrf.mxu0  ;;  %v527_v25 = vpop.f32.mrf.mxu1 }
  0xed   : > { %638 = vst [vmem:[%s1286_s26 + $0x90] sm:$0xff] %v390_v24 }
  0xee   : > { %639 = vst [vmem:[%s1286_s26 + $0x98] sm:$0xff] %v527_v25 }
  0xf0   : > { %v450_v26 = vpop.f32.mrf.mxu2  ;;  %v587_v27 = vpop.f32.mrf.mxu3 }
  0xf1   : > { %678 = vst [vmem:[%s1286_s26 + $0x1d0] sm:$0xff] %v450_v26 }
  0xf2   : > { %679 = vst [vmem:[%s1286_s26 + $0x1d8] sm:$0xff] %v587_v27 }
  0xf4   : > { %v393_v28 = vpop.f32.mrf.mxu0  ;;  %v530_v29 = vpop.f32.mrf.mxu1 }
  0xf5   : > { %640 = vst [vmem:[%s1286_s26 + $0xa0] sm:$0xff] %v393_v28 }
  0xf6   : > { %641 = vst [vmem:[%s1286_s26 + $0xa8] sm:$0xff] %v530_v29 }
  0xf8   : > { %v453_v30 = vpop.f32.mrf.mxu2  ;;  %v590_v31 = vpop.f32.mrf.mxu3 }
  0xf9   : > { %680 = vst [vmem:[%s1286_s26 + $0x1e0] sm:$0xff] %v453_v30 }
  0xfa   : > { %681 = vst [vmem:[%s1286_s26 + $0x1e8] sm:$0xff] %v590_v31 }
  0xfc   : > { %v396_v32 = vpop.f32.mrf.mxu0  ;;  %v533_v33 = vpop.f32.mrf.mxu1 }
  0xfd   : > { %642 = vst [vmem:[%s1286_s26 + $0xb0] sm:$0xff] %v396_v32 }
  0xfe   : > { %643 = vst [vmem:[%s1286_s26 + $0xb8] sm:$0xff] %v533_v33 }
 0x100   : > { %v456_v34 = vpop.f32.mrf.mxu2  ;;  %v593_v35 = vpop.f32.mrf.mxu3 }
 0x101   : > { %682 = vst [vmem:[%s1286_s26 + $0x1f0] sm:$0xff] %v456_v34 }
 0x102   : > { %683 = vst [vmem:[%s1286_s26 + $0x1f8] sm:$0xff] %v593_v35 }
 0x104   : > { %v399_v36 = vpop.f32.mrf.mxu0  ;;  %v536_v37 = vpop.f32.mrf.mxu1 }
 0x105   : > { %644 = vst [vmem:[%s1286_s26 + $0xc0] sm:$0xff] %v399_v36 }
 0x106   : > { %645 = vst [vmem:[%s1286_s26 + $0xc8] sm:$0xff] %v536_v37 }
 0x108   : > { %v459_v38 = vpop.f32.mrf.mxu2  ;;  %v596_v39 = vpop.f32.mrf.mxu3 }
 0x109   : > { %684 = vst [vmem:[%s1286_s26 + $0x200] sm:$0xff] %v459_v38 }
 0x10a   : > { %685 = vst [vmem:[%s1286_s26 + $0x208] sm:$0xff] %v596_v39 }
 0x10c   : > { %v402_v40 = vpop.f32.mrf.mxu0  ;;  %v539_v41 = vpop.f32.mrf.mxu1 }
 0x10d   : > { %646 = vst [vmem:[%s1286_s26 + $0xd0] sm:$0xff] %v402_v40 }
 0x10e   : > { %647 = vst [vmem:[%s1286_s26 + $0xd8] sm:$0xff] %v539_v41 }
 0x110   : > { %v462_v42 = vpop.f32.mrf.mxu2  ;;  %v599_v43 = vpop.f32.mrf.mxu3 }
 0x111   : > { %686 = vst [vmem:[%s1286_s26 + $0x210] sm:$0xff] %v462_v42 }
 0x112   : > { %687 = vst [vmem:[%s1286_s26 + $0x218] sm:$0xff] %v599_v43 }
 0x114   : > { %v405_v44 = vpop.f32.mrf.mxu0  ;;  %v542_v45 = vpop.f32.mrf.mxu1 }
 0x115   : > { %648 = vst [vmem:[%s1286_s26 + $0xe0] sm:$0xff] %v405_v44 }
 0x116   : > { %649 = vst [vmem:[%s1286_s26 + $0xe8] sm:$0xff] %v542_v45 }
 0x118   : > { %v465_v46 = vpop.f32.mrf.mxu2  ;;  %v602_v47 = vpop.f32.mrf.mxu3 }
 0x119   : > { %688 = vst [vmem:[%s1286_s26 + $0x220] sm:$0xff] %v465_v46 }
 0x11a   : > { %689 = vst [vmem:[%s1286_s26 + $0x228] sm:$0xff] %v602_v47 }
 0x11c   : > { %v408_v48 = vpop.f32.mrf.mxu0  ;;  %v545_v49 = vpop.f32.mrf.mxu1 }
 0x11d   : > { %650 = vst [vmem:[%s1286_s26 + $0xf0] sm:$0xff] %v408_v48 }
 0x11e   : > { %651 = vst [vmem:[%s1286_s26 + $0xf8] sm:$0xff] %v545_v49 }
 0x120   : > { %v468_v50 = vpop.f32.mrf.mxu2  ;;  %v605_v51 = vpop.f32.mrf.mxu3 }
 0x121   : > { %690 = vst [vmem:[%s1286_s26 + $0x230] sm:$0xff] %v468_v50 }
 0x122   : > { %691 = vst [vmem:[%s1286_s26 + $0x238] sm:$0xff] %v605_v51 }
 0x124   : > { %v411_v52 = vpop.f32.mrf.mxu0  ;;  %v548_v53 = vpop.f32.mrf.mxu1 }
 0x125   : > { %652 = vst [vmem:[%s1286_s26 + $0x100] sm:$0xff] %v411_v52 }
 0x126   : > { %653 = vst [vmem:[%s1286_s26 + $0x108] sm:$0xff] %v548_v53 }
 0x128   : > { %v471_v54 = vpop.f32.mrf.mxu2  ;;  %v608_v55 = vpop.f32.mrf.mxu3 }
 0x129   : > { %692 = vst [vmem:[%s1286_s26 + $0x240] sm:$0xff] %v471_v54 }
 0x12a   : > { %693 = vst [vmem:[%s1286_s26 + $0x248] sm:$0xff] %v608_v55 }
 0x12c   : > { %v414_v56 = vpop.f32.mrf.mxu0  ;;  %v551_v57 = vpop.f32.mrf.mxu1 }
 0x12d   : > { %654 = vst [vmem:[%s1286_s26 + $0x110] sm:$0xff] %v414_v56 }
 0x12e   : > { %655 = vst [vmem:[%s1286_s26 + $0x118] sm:$0xff] %v551_v57 }
 0x130   : > { %v474_v58 = vpop.f32.mrf.mxu2  ;;  %v611_v59 = vpop.f32.mrf.mxu3 }
 0x131   : > { %694 = vst [vmem:[%s1286_s26 + $0x250] sm:$0xff] %v474_v58 }
 0x132   : > { %695 = vst [vmem:[%s1286_s26 + $0x258] sm:$0xff] %v611_v59 }
 0x134   : > { %v417_v60 = vpop.f32.mrf.mxu0  ;;  %v554_v61 = vpop.f32.mrf.mxu1 }
 0x135   : > { %656 = vst [vmem:[%s1286_s26 + $0x120] sm:$0xff] %v417_v60 }
 0x136   : > { %657 = vst [vmem:[%s1286_s26 + $0x128] sm:$0xff] %v554_v61 }
 0x138   : > { %v477_v62 = vpop.f32.mrf.mxu2  ;;  %v614_v63 = vpop.f32.mrf.mxu3 }
 0x139   : > { %696 = vst [vmem:[%s1286_s26 + $0x260] sm:$0xff] %v477_v62 }
 0x13a   : > { %697 = vst [vmem:[%s1286_s26 + $0x268] sm:$0xff] %v614_v63 }
 0x13c   : > { %v420_v0 = vpop.f32.mrf.mxu0  ;;  %v557_v1 = vpop.f32.mrf.mxu1 }
 0x13d   : > { %658 = vst [vmem:[%s1286_s26 + $0x130] sm:$0xff] %v420_v0 }
 0x13e   : > { %659 = vst [vmem:[%s1286_s26 + $0x138] sm:$0xff] %v557_v1 }
 0x140   : > { %v480_v2 = vpop.f32.mrf.mxu2  ;;  %v617_v3 = vpop.f32.mrf.mxu3 }
 0x141   : > { %698 = vst [vmem:[%s1286_s26 + $0x270] sm:$0xff] %v480_v2 }
 0x142   : > { %699 = vst [vmem:[%s1286_s26 + $0x278] sm:$0xff] %v617_v3 }
 0x143   : > { %985 = shalt.err (!%p982_p5)
}
 0x144   : > { %s1038_s8 = smov 256   ;;  %s1039_s26 = smov 16  }
 0x145   : > { %901 = dma.vmem_to_hbm [thread:$0]  (%p1095_p4), %s716_s27, 10240, %s718_s28, %s701_s12, %s1038_s8, %s1038_s8, %s1039_s26  }
 0x146 PF: > { %p907_p6 = scmp.ge.s32.totalorder %s1036_s14, 2  ;;  %s732_s15 = sand.u32 1, %s1016_s9  }
 0x147   : > { %s733_s16 = scalar_lea.sflag [#allocation3], %s732_s15 }
 0x148   : > { %p904_p7 = pnand %p907_p6, %p1102_p8 }
 0x14a   : > { %p905_p9 = pneg %p904_p7 }
 0x14c   : > { %1011 = dma.done.wait (%p905_p9), %s733_s16, 10240  }
 0x14d   : > { %1013 = vsyncadd (%p905_p9), %s733_s16, 4294957056  ;;  %s15_s14 = sadd.s32 1, %s1036_s14   ;;  %s1444_s9 = smov %s1020_s10 }
 0x14e   : > { %p12_p10 = scmp.ge.s32.totalorder %s15_s14, 4   ;;  %s1445_s10 = smov %s1024_s11 }
 0x14f   : > { %s1446_s11 = smov %s1108_s22  ;;  %s1447_s12 = smov %s1032_s13 }
 0x150   : > { %s1448_s13 = smov %s1450_s17  ;;  %14 = sbr.rel (!%p12_p10) target bundleno = 4 (0x4), region = 63 }
 0x155   :  { %739 = vsyncpa [#allocation3], 1 }
 0x156   :  { %741 = vsyncpa [#allocation3 + $0x1], 1 }

</bundles_post_ra>
